<compile_context>
chip_gen: v7x
topology: tpu7x:2x2x1
jax: 0.10.0
libtpu: 0.0.40
codegen_flags: <defaults>
</compile_context>

<pallas_src>
import functools

import jax
import jax.numpy as jnp
import numpy as np
from jax.experimental import pallas as pl
from jax.experimental.pallas import tpu as pltpu


def _round_up(x, m):
    return (x + m - 1) // m * m


# ---------------------------------------------------------------------------
# Fused kernel: (tokens @ W) + bias [+ LayerNorm over the true embed_dim]
# ---------------------------------------------------------------------------
def _patch_embed_kernel(x_ref, w_ref, c_ref, o_ref, *, apply_norm, eps, n_true):
    # bf16 operands, f32 accumulation on the MXU.
    y = jnp.dot(x_ref[...], w_ref[...], preferred_element_type=jnp.float32)
    y = y + c_ref[0:1, :]                                 # bias (padded lanes = 0)

    if apply_norm:
        # LayerNorm over the TRUE embed_dim (padded lanes are exactly zero, so
        # plain sums are correct; only the divisor must be n_true, not N_pad).
        inv_n = 1.0 / float(n_true)
        mu = jnp.sum(y, axis=-1, keepdims=True) * inv_n
        lane = jax.lax.broadcasted_iota(jnp.int32, y.shape, 1)
        d = jnp.where(lane < n_true, y - mu, 0.0)         # mask padded lanes
        var = jnp.sum(d * d, axis=-1, keepdims=True) * inv_n
        y = d * jax.lax.rsqrt(var + eps)
        y = y * c_ref[1:2, :] + c_ref[2:3, :]             # gamma/beta (pad = 0)

    o_ref[...] = y.astype(o_ref.dtype)


def _patch_embed_matmul(patches_bf, w, b, gamma, beta, *, apply_norm,
                        eps=1e-5, tm_max=2048, out_dtype=jnp.bfloat16):
    """patches_bf: (M, K) bf16, w: (K, N) f32 -> (M, N) tokens in out_dtype."""
    M, K = patches_bf.shape
    K2, N = w.shape
    assert K == K2

    # Lane-dense output: pad embed_dim up to a multiple of 128.
    N_pad = _round_up(N, 128)

    # M-tile: multiple of 16 (bf16 sublane packing), big enough to amortize
    # per-step overhead, but chosen so the parallel grid has >= 2 steps when
    # possible (v7x has 2 TensorCores).
    tm = min(tm_max, max(16, _round_up(pl.cdiv(M, 2), 16)))
    M_pad = _round_up(M, tm)
    if M_pad != M:
        patches_bf = jnp.pad(patches_bf, ((0, M_pad - M), (0, 0)))

    # bf16 weight (tiny), f32 per-channel constants packed into one block.
    w_bf = w.astype(jnp.bfloat16)
    if N_pad != N:
        w_bf = jnp.pad(w_bf, ((0, 0), (0, N_pad - N)))

    consts = [b.reshape(1, N)]
    if apply_norm:
        consts += [gamma.reshape(1, N), beta.reshape(1, N)]
    c = jnp.concatenate(consts, axis=0).astype(jnp.float32)
    if N_pad != N:
        c = jnp.pad(c, ((0, 0), (0, N_pad - N)))          # padded lanes -> 0
    n_const = c.shape[0]

    kernel = functools.partial(_patch_embed_kernel,
                               apply_norm=apply_norm, eps=eps, n_true=N)

    out_bytes = jnp.dtype(out_dtype).itemsize
    # Double-buffered footprint; keep the limit tight and well under v7x 64 MiB.
    vmem_need = 2 * (tm * K * 2 + K * N_pad * 2 + n_const * N_pad * 4
                     + tm * N_pad * out_bytes)
    vmem_limit = int(min(max(4 * vmem_need, 8 * 2 ** 20), 48 * 2 ** 20))

    out = pl.pallas_call(
        kernel,
        out_shape=jax.ShapeDtypeStruct((M_pad, N_pad), out_dtype),
        grid=(M_pad // tm,),
        in_specs=[
            pl.BlockSpec((tm, K), lambda i: (i, 0)),       # M-tiled activation
            pl.BlockSpec((K, N_pad), lambda i: (0, 0)),    # resident weight
            pl.BlockSpec((n_const, N_pad), lambda i: (0, 0)),  # bias/gamma/beta
        ],
        out_specs=pl.BlockSpec((tm, N_pad), lambda i: (i, 0)),
        compiler_params=pltpu.CompilerParams(
            dimension_semantics=("parallel",),
            vmem_limit_bytes=vmem_limit,
        ),
    )(patches_bf, w_bf, c)
    return out[:M, :N]


# ---------------------------------------------------------------------------
# Full PatchEmbed forward
# ---------------------------------------------------------------------------
def patch_embed_forward(x, params, patch_size, apply_norm,
                        out_dtype=jnp.bfloat16, channels_last=False):
    """x: (B, C_in, H, W) -> (B, embed_dim, Wh, Ww)   (or (B, Wh*Ww, E) tokens
    if channels_last=True, which skips the final NCHW transpose entirely)."""
    B, C, H, W = x.shape
    p = patch_size
    pad_h = (-H) % p
    pad_w = (-W) % p

    # Cast to bf16 BEFORE the strided im2col transpose (halves its HBM bytes).
    xb = x.astype(jnp.bfloat16)
    # Matches PyTorch: zero-pad W on the right, H at the bottom.
    xp = jnp.pad(xb, ((0, 0), (0, 0), (0, pad_h), (0, pad_w)))
    Hp, Wp = H + pad_h, W + pad_w
    Wh, Ww = Hp // p, Wp // p

    # im2col for non-overlapping patches; (c, di, dj) ordering matches the
    # Conv2d OIHW weight flatten.
    patches = xp.reshape(B, C, Wh, p, Ww, p)
    patches = patches.transpose(0, 2, 4, 1, 3, 5).reshape(B * Wh * Ww, C * p * p)

    tokens = _patch_embed_matmul(
        patches, params["w"], params["b"],
        params.get("gamma"), params.get("beta"),
        apply_norm=apply_norm, out_dtype=out_dtype,
    )  # (B*Wh*Ww, embed_dim) in out_dtype

    embed_dim = params["w"].shape[1]
    if channels_last:
        return tokens.reshape(B, Wh * Ww, embed_dim)
    # NCHW transpose happens on the (half-size) out_dtype tensor.
    return tokens.reshape(B, Wh, Ww, embed_dim).transpose(0, 3, 1, 2)


# ---------------------------------------------------------------------------
# Deterministic parameter init
#   w: (C_in*p*p, embed_dim)  == Conv2d weight (embed_dim, C_in, p, p) flat + T
# ---------------------------------------------------------------------------
def init_params(in_chans, embed_dim, patch_size, seed=42):
    ks = jax.random.split(jax.random.PRNGKey(seed), 4)
    K = in_chans * patch_size * patch_size
    return {
        "w": 0.1 * jax.random.normal(ks[0], (K, embed_dim), jnp.float32),
        "b": 0.05 * jax.random.normal(ks[1], (embed_dim,), jnp.float32),
        "gamma": 1.0 + 0.1 * jax.random.normal(ks[2], (embed_dim,), jnp.float32),
        "beta": 0.05 * jax.random.normal(ks[3], (embed_dim,), jnp.float32),
    }


# ---------------------------------------------------------------------------
# Pure-JAX reference (independent path: lax strided conv + explicit LayerNorm)
# ---------------------------------------------------------------------------
def ref_forward(x, params, patch_size, apply_norm, eps=1e-5):
    B, C, H, W = x.shape
    p = patch_size
    embed_dim = params["w"].shape[1]
    pad_h = (-H) % p
    pad_w = (-W) % p
    xp = jnp.pad(x, ((0, 0), (0, 0), (0, pad_h), (0, pad_w)))

    wconv = jnp.transpose(params["w"]).reshape(embed_dim, C, p, p)
    y = jax.lax.conv_general_dilated(
        xp, wconv, (p, p), "VALID",
        dimension_numbers=("NCHW", "OIHW", "NCHW"))
    y = y + params["b"][None, :, None, None]

    if apply_norm:
        Bc, E, Wh, Ww = y.shape
        t = y.reshape(Bc, E, Wh * Ww).transpose(0, 2, 1)          # (B, N, E)
        mu = t.mean(-1, keepdims=True)
        var = ((t - mu) ** 2).mean(-1, keepdims=True)
        t = (t - mu) / jnp.sqrt(var + eps)
        t = t * params["gamma"] + params["beta"]
        y = t.transpose(0, 2, 1).reshape(Bc, E, Wh, Ww)
    return y


if __name__ == "__main__":
    patch_size = 4
    in_chans = 3
    embed_dim = 96

    params = init_params(in_chans, embed_dim, patch_size)

    # Config 1: non-multiple spatial dims (exercises the pad path) + LayerNorm.
    k1, k2 = jax.random.split(jax.random.PRNGKey(0))
    x1 = jax.random.normal(k1, (2, in_chans, 18, 19), jnp.float32)
    out1 = jax.block_until_ready(
        patch_embed_forward(x1, params, patch_size, apply_norm=True))
    ref1 = jax.block_until_ready(
        ref_forward(x1, params, patch_size, apply_norm=True))
    assert out1.shape == (2, embed_dim, 5, 5), out1.shape
    np.testing.assert_allclose(np.asarray(out1, dtype=np.float32),
                               np.asarray(ref1, dtype=np.float32),
                               rtol=3e-2, atol=3e-2)

    # Config 2: divisible dims, no norm (PyTorch default norm_layer=None).
    x2 = jax.random.normal(k2, (2, in_chans, 32, 32), jnp.float32)
    out2 = jax.block_until_ready(
        patch_embed_forward(x2, params, patch_size, apply_norm=False))
    ref2 = jax.block_until_ready(
        ref_forward(x2, params, patch_size, apply_norm=False))
    assert out2.shape == (2, embed_dim, 8, 8), out2.shape
    np.testing.assert_allclose(np.asarray(out2, dtype=np.float32),
                               np.asarray(ref2, dtype=np.float32),
                               rtol=3e-2, atol=3e-2)

    print("KERNEL_OK")
</pallas_src>

<mosaic_0001>
module attributes {stable_mosaic.version = 11 : i64} {
  func.func @_patch_embed_kernel(%arg0: i32, %arg1: memref<32x48xbf16, #tpu.memory_space<vmem>>, %arg2: memref<48x128xbf16, #tpu.memory_space<vmem>>, %arg3: memref<3x128xf32, #tpu.memory_space<vmem>>, %arg4: memref<32x128xbf16, #tpu.memory_space<vmem>>) attributes {dimension_semantics = [#tpu.dimension_semantics<parallel>], iteration_bounds = array<i64: 2>, scalar_prefetch = 0 : i64, scratch_operands = 0 : i64, tpu.core_type = #tpu.core_type<tc>, window_params = [{transform_indices = @transform_0, window_bounds = array<i64: 32, 48>}, {pipeline_mode = #tpu.pipeline_mode<synchronous>, transform_indices = @transform_1, window_bounds = array<i64: 48, 128>}, {pipeline_mode = #tpu.pipeline_mode<synchronous>, transform_indices = @transform_2, window_bounds = array<i64: 3, 128>}, {transform_indices = @transform_3, window_bounds = array<i64: 32, 128>}]} {
    %c0 = arith.constant 0 : index
    %c0_0 = arith.constant 0 : index
    %0 = vector.load %arg1[%c0, %c0_0] : memref<32x48xbf16, #tpu.memory_space<vmem>>, vector<32x48xbf16>
    %c0_1 = arith.constant 0 : index
    %c0_2 = arith.constant 0 : index
    %1 = vector.load %arg2[%c0_1, %c0_2] : memref<48x128xbf16, #tpu.memory_space<vmem>>, vector<48x128xbf16>
    %cst = arith.constant dense<0.000000e+00> : vector<32x128xf32>
    %2 = tpu.matmul %0, %1, %cst {dimension_numbers = #tpu.dot_dimension_numbers<[1], [0], [0], [1], [0, 0, 1, 1], [], []>} : vector<32x48xbf16>, vector<48x128xbf16>, vector<32x128xf32> -> vector<32x128xf32>
    %c0_3 = arith.constant 0 : index
    %c0_4 = arith.constant 0 : index
    %3 = vector.load %arg3[%c0_3, %c0_4] : memref<3x128xf32, #tpu.memory_space<vmem>>, vector<1x128xf32>
    %4 = vector.broadcast %3 : vector<1x128xf32> to vector<32x128xf32>
    %5 = arith.addf %2, %4 : vector<32x128xf32>
    %cst_5 = arith.constant dense<0.000000e+00> : vector<32xf32>
    %6 = vector.multi_reduction <add>, %5, %cst_5 [1] : vector<32x128xf32> to vector<32xf32>
    %7 = vector.shape_cast %6 : vector<32xf32> to vector<32x1xf32>
    %cst_6 = arith.constant 0.010416667 : f32
    %8 = vector.broadcast %cst_6 : f32 to vector<32x1xf32>
    %9 = arith.mulf %7, %8 : vector<32x1xf32>
    %10 = tpu.iota {dimensions = array<i32: 1>} : vector<32x128xi32>
    %c96_i32 = arith.constant 96 : i32
    %11 = vector.broadcast %c96_i32 : i32 to vector<32x128xi32>
    %12 = arith.cmpi slt, %10, %11 : vector<32x128xi32>
    %13 = vector.broadcast %9 : vector<32x1xf32> to vector<32x128xf32>
    %14 = arith.subf %5, %13 : vector<32x128xf32>
    %cst_7 = arith.constant 0.000000e+00 : f32
    %15 = vector.broadcast %cst_7 : f32 to vector<32x128xf32>
    %16 = arith.select %12, %14, %15 : vector<32x128xi1>, vector<32x128xf32>
    %17 = arith.mulf %16, %16 : vector<32x128xf32>
    %cst_8 = arith.constant dense<0.000000e+00> : vector<32xf32>
    %18 = vector.multi_reduction <add>, %17, %cst_8 [1] : vector<32x128xf32> to vector<32xf32>
    %19 = vector.shape_cast %18 : vector<32xf32> to vector<32x1xf32>
    %cst_9 = arith.constant 0.010416667 : f32
    %20 = vector.broadcast %cst_9 : f32 to vector<32x1xf32>
    %21 = arith.mulf %19, %20 : vector<32x1xf32>
    %cst_10 = arith.constant 9.99999974E-6 : f32
    %22 = vector.broadcast %cst_10 : f32 to vector<32x1xf32>
    %23 = arith.addf %21, %22 : vector<32x1xf32>
    %24 = math.rsqrt %23 : vector<32x1xf32>
    %25 = vector.broadcast %24 : vector<32x1xf32> to vector<32x128xf32>
    %26 = arith.mulf %16, %25 : vector<32x128xf32>
    %c1 = arith.constant 1 : index
    %c0_11 = arith.constant 0 : index
    %27 = vector.load %arg3[%c1, %c0_11] : memref<3x128xf32, #tpu.memory_space<vmem>>, vector<1x128xf32>
    %28 = vector.broadcast %27 : vector<1x128xf32> to vector<32x128xf32>
    %29 = arith.mulf %26, %28 : vector<32x128xf32>
    %c2 = arith.constant 2 : index
    %c0_12 = arith.constant 0 : index
    %30 = vector.load %arg3[%c2, %c0_12] : memref<3x128xf32, #tpu.memory_space<vmem>>, vector<1x128xf32>
    %31 = vector.broadcast %30 : vector<1x128xf32> to vector<32x128xf32>
    %32 = arith.addf %29, %31 : vector<32x128xf32>
    %33 = arith.truncf %32 : vector<32x128xf32> to vector<32x128xbf16>
    %c0_13 = arith.constant 0 : index
    %c0_14 = arith.constant 0 : index
    %34 = vector.load %arg4[%c0_13, %c0_14] : memref<32x128xbf16, #tpu.memory_space<vmem>>, vector<32x128xbf16>
    tpu.vector_store %arg4[%c0_13, %c0_14], %33 {strides = array<i32>} : memref<32x128xbf16, #tpu.memory_space<vmem>>, vector<32x128xbf16>,
    return
  }
  func.func @transform_0(%arg0: i32) -> (i32, i32) {
    %c0_i32 = arith.constant 0 : i32
    %c0_i32_0 = arith.constant 0 : i32
    return %arg0, %c0_i32 : i32, i32
  }
  func.func @transform_1(%arg0: i32) -> (i32, i32) {
    %c0_i32 = arith.constant 0 : i32
    %c0_i32_0 = arith.constant 0 : i32
    %c0_i32_1 = arith.constant 0 : i32
    return %c0_i32, %c0_i32_0 : i32, i32
  }
  func.func @transform_2(%arg0: i32) -> (i32, i32) {
    %c0_i32 = arith.constant 0 : i32
    %c0_i32_0 = arith.constant 0 : i32
    %c0_i32_1 = arith.constant 0 : i32
    return %c0_i32, %c0_i32_0 : i32, i32
  }
  func.func @transform_3(%arg0: i32) -> (i32, i32) {
    %c0_i32 = arith.constant 0 : i32
    %c0_i32_0 = arith.constant 0 : i32
    return %arg0, %c0_i32 : i32, i32
  }
}

</mosaic_0001>

<bundles_post_ra>
// kernel: tpu_custom_call.1
= control target key start
LH: loop header
LB: loop body
LE: loop exit
PB: predicated region body
PF: predicated region fallthrough
CT: control target
= control target key end

     0   :  { %8 = vsyncpa [#allocation3], 0  ;;  %s759_s0 = inlined_call_operand.vmem [shape: bf16[64,48], index: 0, kind: input, shape index: {}]   ;;  %s760_s1 = inlined_call_operand.vmem [shape: bf16[48,128], index: 1, kind: input, shape index: {}]   ;;  %s761_s2 = inlined_call_operand.vmem [shape: f32[3,128], index: 2, kind: input, shape index: {}]   ;;  %s762_s3 = inlined_call_operand.hbm [shape: bf16[64,128], index: 3, kind: output, shape index: {}]  }
   0x1   :  { %10 = vsyncpa [#allocation3 + $0x1], 0  ;;  %s635_s12 = smov 0   ;;  %s637_s13 = smov 0  }
   0x2   :  { %s639_s14 = smov 0   ;;  %s641_s15 = smov 0  }
   0x3 LB: > { %s656_s16 = sadd.s32 4294967295, %s610_s15   ;;  %s437_s17 = sadd.s32 4294967294, %s610_s15   ;;  %s610_s15 = sphi %s641_s15, %s768_s15   ;;  %s606_s14 = sphi %s639_s14, %s767_s14   ;;  %s602_s13 = sphi %s637_s13, %s766_s13   ;;  %s598_s12 = sphi %s635_s12, %s765_s12  }
   0x4   : > { %s660_s18 = sadd.s32 1, %s610_s15   ;;  %s91_s19 = sadd.s32 1, %s606_s14 }
   0x5   : > { %s88_s20 = ssub.s32 %s610_s15, %s660_s18  ;;  %p101_p0 = scmp.ne.s32.totalorder %s606_s14, %s602_s13 }
   0x6   : > { %p89_p1 = scmp.eq.s32.totalorder %s88_s20, 0  ;;  %p102_p2 = scmp.eq.s32.totalorder %s656_s16, 1 }
   0x7   : > { %p107_p3 = scmp.ne.s32.totalorder %s602_s13, %s598_s12  ;;  %p108_p4 = scmp.eq.s32.totalorder %s437_s17, 1 }
   0x8   : > { %s671_s21 = scalar_select %p89_p1, %s606_s14, %s91_s19  }
   0x9   : > { %p673_p5 = por %p102_p2, %p101_p0  ;;  %p677_p6 = por %p108_p4, %p107_p3 }
   0xa   : > { %p440_p7 = scmp.ge.s32.totalorder %s610_s15, 1  ;;  %p141_p8 = scmp.lt.s32.totalorder %s610_s15, 3 }
   0xc   : > { %p142_p9 = pnand %p440_p7, %p141_p8 }
   0xd   : > { %v535_v0 = vld [vmem:[%s760_s1] sm:$0xff] (!%p142_p9)   ;;  %s442_s26 = sshll.u32 (!%p142_p9), %s656_s16, 2  ;;  %v536_v1 = vld [vmem:[%s760_s1 + $0x8] sm:$0xff] (!%p142_p9)   ;;  %v537_v2 = vld [vmem:[%s760_s1 + $0x10] sm:$0xff] (!%p142_p9)   ;;  %vm216_vm0 = vcmask (!%p142_p9), 392192   ;;  %v284_v14 = vlaneseq (!%p142_p9)  ;;  %s162_s17 = sand.u32 (!%p142_p9), 1, %s602_s13  }
   0xe   : > { %145 = sbr.rel (%p142_p9) target bundleno = 578 (0x242), region = 32  ;;  %p166_p10 = scmp.lt.s32.totalorder (!%p142_p9), %s442_s26, 7  ;;  %484 = vmatprep.subr.bf16.mxu0 (!%p142_p9), %v535_v0  ;;  %v444_v5 = vld [vmem:[%s761_s2] ss:$0 sm:$0xff] (!%p142_p9)  ;;  %v452_v50 = vld [vmem:[%s761_s2 + $0x1] ss:$0 sm:$0xff] (!%p142_p9) }
   0xf   : > { %485 = vmatpush3.bf16.msra.mxu0 (!%p142_p9), %v535_v0  ;;  %v285_v15 = vand.u32 (!%p142_p9), 127, %v284_v14  ;;  %v453_v56 = vld [vmem:[%s761_s2 + $0x2] ss:$0 sm:$0xff] (!%p142_p9)  ;;  %s441_s24 = sshll.u32 (!%p142_p9), %s162_s17, 4  ;;  %s467_s25 = sshll.u32 (!%p142_p9), %s656_s16, 8 }
  0x10   : > { %486 = vmatprep.subr.bf16.mxu0 (!%p142_p9), %v536_v1  ;;  %s714_s30 = scalar_lea.hbm (!%p142_p9), %s762_s3, %s467_s25  ;;  %s612_s5 = smov (!%p142_p9), [#allocation2]  }
  0x11   : > { %vm286_vm1 = vcmp.lt.s32.totalorder (!%p142_p9), %v285_v15, 96  ;;  %s552_s6 = sshll.u32 (!%p142_p9), %s612_s5, 4  ;;  %s553_s6 = int_to_ptr.vmem [resolvable:$false] %s552_s6 }
  0x13   : > { %487 = vmatpush3.bf16.msra.mxu0 (!%p142_p9), %v536_v1 }
  0x14   : > { %488 = vmatprep.subr.bf16.mxu0 (!%p142_p9), %v537_v2 }
  0x15   : > { %s770_s26 = smov (!%p166_p10, %s442_s26), 7 }
  0x16   : > { %s443_s4 = sshll.u32 %s770_s26, 2  ;;  %s164_s26 = scalar_lea.vmem [#allocation2], %s441_s24 }
  0x17   : > { %s169_s7 = scalar_lea.vmem %s759_s0, %s443_s4  ;;  %489 = vmatpush3.bf16.msra.mxu0 %v537_v2  ;;  %s375_s27 = sshll.u32 %s164_s26, 4  ;;  %s716_s27 = int_to_ptr.vmem [resolvable:$true] %s375_s27 }
  0x18   : > { %v538_v3 = vld [vmem:[%s169_s7] sm:$0xff]   ;;  %v539_v4 = vld [vmem:[%s169_s7 + $0x8] sm:$0xff]   ;;  %s718_s4 = scalar_lea.sflag [#allocation3], %s162_s17  ;;  %s548_s16 = scalar_lea.vmem %s716_s27, 256 }
  0x19   : > { %490 = vmatprep.mubr.msk.bf16.mxu0 %vm216_vm0, %v538_v3  ;;  %p549_p11 = scmp.ne.s32.totalorder %s716_s27, %s548_s16  ;;  %s554_s7 = scalar_lea.vmem %s553_s6, 512 }
  0x1a   : > { %491 = vmatmul.mubr.msk.bf16.vlgmr.msra.gmra.mrb[0].mxu0 %vm216_vm0, %v539_v4  ;;  %p555_p0 = scmp.lt.s32.totalorder %s716_s27, %s553_s6  ;;  %p556_p1 = scmp.lt.s32.totalorder %s554_s7, %s548_s16 }
  0x1b   : > { %p550_p12 = pnand %p549_p11, %p673_p5 }
  0x1c   : > { %p557_p2 = por %p556_p1, %p555_p0 }
  0x1d   : > { %p551_p13 = pneg %p550_p12 }
  0x1f   : > { %p558_p3 = pnand %p557_p2, %p551_p13 }
  0xed   : > { %v492_v6 = vpop.f32.mrb[0].mxu0 }
  0xee   : > { %v266_v7 = vadd.f32 %v492_v6, %v444_v5  ;;  %v257_v8 = vpop.f32.mrb[1].mxu0 }
  0xef   : > { %v258_v9 = vadd.f32 %v444_v5, %v257_v8  ;;  %v493_v10 = vpop.f32.mrb[2].mxu0 }
  0xf0   : > { %276 = vadd.xlane.f32.xlu1 %v266_v7  ;;  %v260_v11 = vpop.f32.mrb[3].mxu0  ;;  %v269_v12 = vadd.f32 %v493_v10, %v444_v5 }
  0xf1   : > { %272 = vadd.xlane.f32.xlu0 %v258_v9  ;;  %v261_v13 = vadd.f32 %v444_v5, %v260_v11 }
  0xf4   : > { %278 = vadd.xlane.f32.xlu1 %v269_v12 }
  0xf5   : > { %274 = vadd.xlane.f32.xlu0 %v261_v13 }
 0x17d   : > { %v277_v16 = vpop.xlane.xlu1 %276 }
 0x17e   : > { %v282_v17 = vmul.f32 0.010416667, %v277_v16  ;;  %v273_v18 = vpop.xlane.xlu0 %272 }
 0x17f   : > { %v280_v19 = vmul.f32 0.010416667, %v273_v18 }
 0x180   : > { %v289_v20 = vsub.f32 %v266_v7, %v282_v17 }
 0x181   : > { %v287_v21 = vsub.f32 %v258_v9, %v280_v19  ;;  %v279_v22 = vpop.xlane.xlu1 %278 }
 0x182   : > { %v283_v23 = vmul.f32 0.010416667, %v279_v22  ;;  %v275_v24 = vpop.xlane.xlu0 %274  ;;  %v293_v30 = vsel %vm286_vm1, %v289_v20, 0.0 }
 0x183   : > { %v281_v25 = vmul.f32 0.010416667, %v275_v24  ;;  %v291_v26 = vsel %vm286_vm1, %v287_v21, 0.0  ;;  %v297_v32 = vmul.f32 %v293_v30, %v293_v30 }
 0x184   : > { %v295_v27 = vmul.f32 %v291_v26, %v291_v26  ;;  %v290_v28 = vsub.f32 %v269_v12, %v283_v23 }
 0x185   : > { %v288_v29 = vsub.f32 %v261_v13, %v281_v25 }
 0x186   : > { %299 = vadd.xlane.f32.xlu0 %v295_v27  ;;  %v294_v34 = vsel %vm286_vm1, %v290_v28, 0.0 }
 0x187   : > { %v292_v31 = vsel %vm286_vm1, %v288_v29, 0.0  ;;  %v298_v35 = vmul.f32 %v294_v34, %v294_v34 }
 0x188   : > { %v296_v33 = vmul.f32 %v292_v31, %v292_v31 }
 0x18a   : > { %303 = vadd.xlane.f32.xlu0 %v297_v32  ;;  %301 = vadd.xlane.f32.xlu1 %v296_v33 }
 0x18e   : > { %305 = vadd.xlane.f32.xlu1 %v298_v35 }
 0x213   : > { %v300_v36 = vpop.xlane.xlu0 %299 }
 0x214   : > { %v307_v37 = vmul.f32 0.010416667, %v300_v36 }
 0x216   : > { %v311_v38 = vadd.f32 1e-05, %v307_v37 }
 0x217   : > { %v302_v39 = vpop.xlane.xlu1 %301  ;;  %v304_v40 = vpop.xlane.xlu0 %303 }
 0x218   : > { %540 = vrsqrt.f32 %v311_v38  ;;  %v308_v41 = vmul.f32 0.010416667, %v302_v39  ;;  %v309_v42 = vmul.f32 0.010416667, %v304_v40 }
 0x21a   : > { %v312_v43 = vadd.f32 1e-05, %v308_v41  ;;  %v313_v44 = vadd.f32 1e-05, %v309_v42 }
 0x21b   : > { %v306_v45 = vpop.xlane.xlu1 %305 }
 0x21c   : > { %542 = vrsqrt.f32 %v312_v43  ;;  %v310_v46 = vmul.f32 0.010416667, %v306_v45 }
 0x21d   : > { %544 = vrsqrt.f32 %v313_v44 }
 0x21e   : > { %v314_v47 = vadd.f32 1e-05, %v310_v46 }
 0x220   : > { %546 = vrsqrt.f32 %v314_v47 }
 0x222   : > { %v541_v48 = vpop.eup %540 }
 0x223   : > { %v319_v49 = vmul.f32 %v541_v48, %v291_v26 }
 0x225   : > { %v328_v53 = vmul.f32 %v452_v50, %v319_v49 }
 0x226   : > { %v543_v51 = vpop.eup %542 }
 0x227   : > { %v545_v52 = vpop.eup %544  ;;  %v320_v54 = vmul.f32 %v543_v51, %v292_v31  ;;  %v337_v61 = vadd.f32 %v453_v56, %v328_v53 }
 0x228   : > { %v321_v55 = vmul.f32 %v545_v52, %v293_v30 }
 0x229   : > { %v329_v57 = vmul.f32 %v452_v50, %v320_v54 }
 0x22a   : > { %v547_v58 = vpop.eup %546  ;;  %v330_v59 = vmul.f32 %v452_v50, %v321_v55 }
 0x22b   : > { %v322_v60 = vmul.f32 %v547_v58, %v294_v34  ;;  %v338_v62 = vadd.f32 %v453_v56, %v329_v57 }
 0x22c   : > { %v339_v1 = vadd.f32 %v453_v56, %v330_v59 }
 0x22d   : > { %v331_v63 = vmul.f32 %v452_v50, %v322_v60  ;;  %v471_v0 = vpack.c.bf16 %v338_v62, %v337_v61 }
 0x22f   : > { %v340_v2 = vadd.f32 %v453_v56, %v331_v63  ;;  %472 = vst [vmem:[%s164_s26] sm:$0xff] %v471_v0  }
 0x231   : > { %v476_v3 = vpack.c.bf16 %v340_v2, %v339_v1 }
 0x233   : > { %478 = vst [vmem:[%s164_s26 + $0x8] sm:$0xff] %v476_v3  }
 0x234   : > { %561 = shalt.err (!%p558_p3)
}
 0x235   : > { %s562_s8 = scalar_lea.hbm %s714_s30, 256  ;;  %s566_s11 = scalar_lea.hbm %s762_s3, 512 }
 0x236   : > { %p563_p4 = scmp.ne.s32.totalorder %s714_s30, %s562_s8  ;;  %p567_p9 = scmp.lt.u32.totalorder %s714_s30, %s762_s3 }
 0x237   : > { %p568_p10 = scmp.lt.u32.totalorder %s566_s11, %s562_s8  ;;  %p570_p12 = scmp.lt.u32.totalorder %s562_s8, %s714_s30 }
 0x238   : > { %p564_p7 = pnand %p563_p4, %p673_p5 }
 0x239   : > { %p569_p11 = por %p568_p10, %p567_p9 }
 0x23a   : > { %p565_p8 = pneg %p564_p7 }
 0x23b   : > { %p571_p13 = por %p570_p12, %p569_p11 }
 0x23d   : > { %p572_p0 = pnand %p571_p13, %p565_p8 }
 0x23f   : > { %575 = shalt.err (!%p572_p0)
}
 0x240   : > { %s613_s20 = smov 64   ;;  %s614_s24 = smov 4  }
 0x241   : > { %494 = dma.vmem_to_hbm [thread:$0]  (%p673_p5), %s716_s27, 256, %s714_s30, %s718_s4, %s613_s20, %s613_s20, %s614_s24  }
 0x242 PF: > { %p500_p1 = scmp.ge.s32.totalorder %s610_s15, 2  ;;  %s390_s25 = sand.u32 1, %s598_s12  }
 0x243   : > { %s391_s26 = scalar_lea.sflag [#allocation3], %s390_s25 }
 0x244   : > { %p497_p2 = pnand %p500_p1, %p677_p6 }
 0x246   : > { %593 = dma.done.wait (!%p497_p2), %s391_s26, 256  }
 0x247   : > { %595 = vsyncadd (!%p497_p2), %s391_s26, 4294967040  ;;  %p13_p3 = scmp.ge.s32.totalorder %s660_s18, 4   ;;  %s765_s12 = smov %s602_s13 }
 0x248   : > { %s766_s13 = smov %s606_s14  ;;  %s767_s14 = smov %s671_s21 }
 0x249   : > { %s768_s15 = smov %s660_s18  ;;  %15 = sbr.rel (!%p13_p3) target bundleno = 3 (0x3), region = 67 }
 0x250   :  { %396 = vsyncpa [#allocation3], 1 }
 0x251   :  { %398 = vsyncpa [#allocation3 + $0x1], 1 }

</bundles_post_ra>
